<compile_context>
chip_gen: v7x
topology: tpu7x:2x2x1
jax: 0.10.0
libtpu: 0.0.40
codegen_flags: <defaults>
</compile_context>

<pallas_src>
import functools

import jax
import jax.numpy as jnp
from jax import lax
from jax.experimental import pallas as pl
from jax.experimental.pallas import tpu as pltpu


def _round_up(x, m):
    return (x + m - 1) // m * m


def _feature_loss_kernel(x_ref, t_ref, ent_ref, cont_ref, *, k, w, l):
    """One (TILE_BC, Lp) tile of both signals -> two per-tile partial sums.

    ent_ref[0,0]  = sum over valid windows of |raw_ent_x - raw_ent_t|
    cont_ref[0,0] = sum over valid windows of (raw_cont_x - raw_cont_t)^2
    where raw_ent = T/S - log S (un-normalized entropy*k) and raw_cont = window
    sum (un-normalized mean*k).  The 1/k and 1/N scalings are applied in JAX.
    """
    x = x_ref[...].astype(jnp.float32)      # inputs DMA'd in their own dtype
    t = t_ref[...].astype(jnp.float32)
    rows, lp = x.shape

    col = lax.broadcasted_iota(jnp.int32, (rows, lp), 1)
    in_row = col < l        # real signal columns (rest is lane padding)
    valid = col < w         # real window starts (w = L - k + 1)

    def features(v):
        # Per-row max over valid columns only (padding is 0 and must not win).
        rowmax = jnp.max(jnp.where(in_row, v, jnp.float32(-3.0e38)),
                         axis=1, keepdims=True)
        z = jnp.where(in_row, v - rowmax, 0.0)   # padded cols -> z=0 (no inf/nan)
        e = jnp.exp(z)                            # ONE exp per element (EUP)
        ze = z * e

        # Window sums via XLU rotates; window i never touches padded columns
        # for i < w, so wrapped columns only land in masked outputs.
        s, tz, csum = e, ze, v
        # TODO(synk): for large k (>~8) offload these banded sums to the idle
        # MXU via a static 0/1 (Lp x Lp) band matrix.
        for j in range(1, k):
            sh = lp - j   # result[:, i] = src[:, (i + j) % lp]
            s = s + pltpu.roll(e, shift=sh, axis=1)
            tz = tz + pltpu.roll(ze, shift=sh, axis=1)
            csum = csum + pltpu.roll(v, shift=sh, axis=1)

        inv_s = pl.reciprocal(s, approx=True)     # EUP, slot has slack
        ent = tz * inv_s - jnp.log(s)             # = k * mean_k(p * log p)
        return ent, csum                          # csum = k * mean_k(window)

    ent_x, cont_x = features(x)
    ent_t, cont_t = features(t)

    ent_ref[0, 0] = jnp.sum(jnp.where(valid, jnp.abs(ent_x - ent_t), 0.0))
    cont_ref[0, 0] = jnp.sum(jnp.where(valid, jnp.square(cont_x - cont_t), 0.0))


def feature_profile_loss(inp, tgt, entropy_loss, content_loss, *, k,
                         tile_bc=None, vmem_limit_bytes=32 * 1024 * 1024):
    """Mirrors Loss.forward of the PyTorch module.

    Args:
      inp, tgt: (B, C, L) signals (f32 or bf16).
      entropy_loss, content_loss: scalar running losses.
      k: window size.
    Returns:
      (inp, tgt, entropy_loss + L1(ent_in, ent_tgt),
                 content_loss + MSE(cont_in, cont_tgt))
    """
    B, C, L = inp.shape
    assert tgt.shape == inp.shape
    assert 1 <= k <= L
    BC = B * C
    W = L - k + 1
    Lp = _round_up(L, 128)   # lane-align; padded columns are masked in-kernel
    # TODO(synk): for very large L (>~8-16K) also tile the L axis with a (k-1) halo.

    if tile_bc is None:
        # O(1)-live restructure: ~12-14 live f32 (rows,Lp) intermediates
        # + 2 inputs x 2 pipeline buffers in the input dtype.
        bytes_per_row = (2 * 2 * inp.dtype.itemsize + 14 * 4) * Lp
        budget, cap = 8 * 1024 * 1024, 256          # safe on v7x (64 MiB VMEM)
        try:
            info = pltpu.get_tpu_info()
            vmem_cap = getattr(info, "vmem_capacity_bytes", 0)
            if vmem_cap and vmem_cap >= 100 * 1024 * 1024:
                budget, cap = 20 * 1024 * 1024, 512  # v5e/v6e: 128 MiB VMEM
        except Exception:
            pass
        tile_bc = budget // bytes_per_row
        tile_bc = max(8, min(cap, (tile_bc // 8) * 8))
    tile_bc = min(tile_bc, _round_up(BC, 8))
    BCp = _round_up(BC, tile_bc)
    num_tiles = BCp // tile_bc

    def prep(a):
        # (B, C, L) -> (BCp, Lp); zero-padded rows produce identical features
        # for x and t (zero diff) and padded columns are masked in-kernel.
        a2 = a.reshape(BC, L)
        return jnp.pad(a2, ((0, BCp - BC), (0, Lp - L)))

    xf = prep(inp)
    tf = prep(tgt)

    kernel = functools.partial(_feature_loss_kernel, k=k, w=W, l=L)

    cost = pl.CostEstimate(
        flops=int(2 * (3 * k + 8) * BCp * Lp),
        transcendentals=int(2 * 3 * BCp * Lp),      # exp + log + recip per signal
        bytes_accessed=int(2 * BCp * Lp * inp.dtype.itemsize + 8 * num_tiles),
    )

    ent_parts, cont_parts = pl.pallas_call(
        kernel,
        out_shape=(
            jax.ShapeDtypeStruct((num_tiles, 1), jnp.float32),
            jax.ShapeDtypeStruct((num_tiles, 1), jnp.float32),
        ),
        grid=(num_tiles,),
        in_specs=[
            # TODO(synk): on v5e, if DMA waits dominate after the EUP reduction,
            # add pipeline_mode=pl.Buffered(3) to both input specs.
            pl.BlockSpec((tile_bc, Lp), lambda i: (i, 0)),
            pl.BlockSpec((tile_bc, Lp), lambda i: (i, 0)),
        ],
        out_specs=(
            pl.BlockSpec((1, 1), lambda i: (i, 0),
                         memory_space=pltpu.MemorySpace.SMEM),
            pl.BlockSpec((1, 1), lambda i: (i, 0),
                         memory_space=pltpu.MemorySpace.SMEM),
        ),
        compiler_params=pltpu.CompilerParams(
            # Tiles are fully independent (per-tile partial sums) -> "parallel"
            # lets both v7x TensorCores split the grid.
            dimension_semantics=("parallel",),
            vmem_limit_bytes=vmem_limit_bytes,
        ),
        cost_estimate=cost,
    )(xf, tf)

    # Final reduction + deferred 1/k and 1/N scalings (scalar work, done in JAX).
    n_valid = BC * W
    inv_k = 1.0 / float(k)
    ent_l = jnp.sum(ent_parts) * jnp.float32(inv_k / n_valid)
    cont_l = jnp.sum(cont_parts) * jnp.float32(inv_k * inv_k / n_valid)

    return (inp, tgt, entropy_loss + ent_l, content_loss + cont_l)


def _reference(inp, tgt, entropy_loss, content_loss, k):
    """Pure-JAX reference matching the PyTorch semantics."""
    def feats(x):
        B, C, L = x.shape
        W = L - k + 1
        win = jnp.stack([x[:, :, j:j + W] for j in range(k)], axis=-1)
        p = jax.nn.softmax(win, axis=-1)
        lp = jax.nn.log_softmax(win, axis=-1)
        return jnp.mean(p * lp, axis=-1), jnp.mean(win, axis=-1)

    ei, ci = feats(inp.astype(jnp.float32))
    et, ct = feats(tgt.astype(jnp.float32))
    return (entropy_loss + jnp.mean(jnp.abs(ei - et)),
            content_loss + jnp.mean((ci - ct) ** 2))


if __name__ == "__main__":
    key = jax.random.PRNGKey(0)

    # --- test 1: small shape, single tile -----------------------------------
    B, C, L, k = 2, 4, 16, 4
    k1, k2, k3, k4 = jax.random.split(key, 4)
    inp = jax.random.normal(k1, (B, C, L), dtype=jnp.float32)
    tgt = jax.random.normal(k2, (B, C, L), dtype=jnp.float32)
    e0 = jnp.float32(0.0)
    c0 = jnp.float32(0.0)

    out = feature_profile_loss(inp, tgt, e0, c0, k=k)
    out = jax.block_until_ready(out)
    _, _, ent_loss, cont_loss = out
    ref_ent, ref_cont = _reference(inp, tgt, e0, c0, k)
    # Tolerances widened slightly for pl.reciprocal(approx=True).
    assert jnp.allclose(ent_loss, ref_ent, atol=1e-4, rtol=1e-4), (ent_loss, ref_ent)
    assert jnp.allclose(cont_loss, ref_cont, atol=1e-4, rtol=1e-4), (cont_loss, ref_cont)

    # --- test 2: multi-tile parallel grid (forced TILE_BC=8) + non-aligned L --
    B2, C2, L2, k2w = 4, 8, 300, 5
    inp2 = jax.random.normal(k3, (B2, C2, L2), dtype=jnp.float32)
    tgt2 = jax.random.normal(k4, (B2, C2, L2), dtype=jnp.float32)
    out2 = feature_profile_loss(inp2, tgt2, e0, c0, k=k2w, tile_bc=8)
    out2 = jax.block_until_ready(out2)
    _, _, ent_loss2, cont_loss2 = out2
    ref_ent2, ref_cont2 = _reference(inp2, tgt2, e0, c0, k2w)
    assert jnp.allclose(ent_loss2, ref_ent2, atol=2e-4, rtol=2e-4), (ent_loss2, ref_ent2)
    assert jnp.allclose(cont_loss2, ref_cont2, atol=2e-4, rtol=2e-4), (cont_loss2, ref_cont2)

    print("KERNEL_OK")
</pallas_src>

<mosaic_0001>
module attributes {stable_mosaic.version = 11 : i64} {
  func.func @_feature_loss_kernel(%arg0: i32, %arg1: memref<8x128xf32, #tpu.memory_space<vmem>>, %arg2: memref<8x128xf32, #tpu.memory_space<vmem>>, %arg3: memref<1x1xf32, #tpu.memory_space<smem>>, %arg4: memref<1x1xf32, #tpu.memory_space<smem>>) attributes {dimension_semantics = [#tpu.dimension_semantics<parallel>], iteration_bounds = array<i64: 1>, scalar_prefetch = 0 : i64, scratch_operands = 0 : i64, tpu.core_type = #tpu.core_type<tc>, window_params = [{transform_indices = @transform_0, window_bounds = array<i64: 8, 128>}, {transform_indices = @transform_1, window_bounds = array<i64: 8, 128>}, {transform_indices = @transform_2, window_bounds = array<i64: 1, 1>}, {transform_indices = @transform_3, window_bounds = array<i64: 1, 1>}]} {
    %c0 = arith.constant 0 : index
    %c0_0 = arith.constant 0 : index
    %0 = vector.load %arg1[%c0, %c0_0] : memref<8x128xf32, #tpu.memory_space<vmem>>, vector<8x128xf32>
    %c0_1 = arith.constant 0 : index
    %c0_2 = arith.constant 0 : index
    %1 = vector.load %arg2[%c0_1, %c0_2] : memref<8x128xf32, #tpu.memory_space<vmem>>, vector<8x128xf32>
    %2 = tpu.iota {dimensions = array<i32: 1>} : vector<8x128xi32>
    %c16_i32 = arith.constant 16 : i32
    %3 = vector.broadcast %c16_i32 : i32 to vector<8x128xi32>
    %4 = arith.cmpi slt, %2, %3 : vector<8x128xi32>
    %c13_i32 = arith.constant 13 : i32
    %5 = vector.broadcast %c13_i32 : i32 to vector<8x128xi32>
    %6 = arith.cmpi slt, %2, %5 : vector<8x128xi32>
    %cst = arith.constant -3.000000e+38 : f32
    %7 = vector.broadcast %cst : f32 to vector<8x128xf32>
    %8 = arith.select %4, %0, %7 : vector<8x128xi1>, vector<8x128xf32>
    %cst_3 = arith.constant dense<0xFF800000> : vector<8xf32>
    %9 = vector.multi_reduction <maximumf>, %8, %cst_3 [1] : vector<8x128xf32> to vector<8xf32>
    %10 = vector.shape_cast %9 : vector<8xf32> to vector<8x1xf32>
    %11 = vector.broadcast %10 : vector<8x1xf32> to vector<8x128xf32>
    %12 = arith.subf %0, %11 : vector<8x128xf32>
    %cst_4 = arith.constant 0.000000e+00 : f32
    %13 = vector.broadcast %cst_4 : f32 to vector<8x128xf32>
    %14 = arith.select %4, %12, %13 : vector<8x128xi1>, vector<8x128xf32>
    %15 = math.exp %14 : vector<8x128xf32>
    %16 = arith.mulf %14, %15 : vector<8x128xf32>
    %c127_i32 = arith.constant 127 : i32
    %17 = tpu.dynamic_rotate %15 by %c127_i32 dim 1 : vector<8x128xf32>, i32 -> vector<8x128xf32>
    %18 = arith.addf %15, %17 : vector<8x128xf32>
    %c127_i32_5 = arith.constant 127 : i32
    %19 = tpu.dynamic_rotate %16 by %c127_i32_5 dim 1 : vector<8x128xf32>, i32 -> vector<8x128xf32>
    %20 = arith.addf %16, %19 : vector<8x128xf32>
    %c127_i32_6 = arith.constant 127 : i32
    %21 = tpu.dynamic_rotate %0 by %c127_i32_6 dim 1 : vector<8x128xf32>, i32 -> vector<8x128xf32>
    %22 = arith.addf %0, %21 : vector<8x128xf32>
    %c126_i32 = arith.constant 126 : i32
    %23 = tpu.dynamic_rotate %15 by %c126_i32 dim 1 : vector<8x128xf32>, i32 -> vector<8x128xf32>
    %24 = arith.addf %18, %23 : vector<8x128xf32>
    %c126_i32_7 = arith.constant 126 : i32
    %25 = tpu.dynamic_rotate %16 by %c126_i32_7 dim 1 : vector<8x128xf32>, i32 -> vector<8x128xf32>
    %26 = arith.addf %20, %25 : vector<8x128xf32>
    %c126_i32_8 = arith.constant 126 : i32
    %27 = tpu.dynamic_rotate %0 by %c126_i32_8 dim 1 : vector<8x128xf32>, i32 -> vector<8x128xf32>
    %28 = arith.addf %22, %27 : vector<8x128xf32>
    %c125_i32 = arith.constant 125 : i32
    %29 = tpu.dynamic_rotate %15 by %c125_i32 dim 1 : vector<8x128xf32>, i32 -> vector<8x128xf32>
    %30 = arith.addf %24, %29 : vector<8x128xf32>
    %c125_i32_9 = arith.constant 125 : i32
    %31 = tpu.dynamic_rotate %16 by %c125_i32_9 dim 1 : vector<8x128xf32>, i32 -> vector<8x128xf32>
    %32 = arith.addf %26, %31 : vector<8x128xf32>
    %c125_i32_10 = arith.constant 125 : i32
    %33 = tpu.dynamic_rotate %0 by %c125_i32_10 dim 1 : vector<8x128xf32>, i32 -> vector<8x128xf32>
    %34 = arith.addf %28, %33 : vector<8x128xf32>
    %35 = tpu.reciprocal %30 {approx = true} : vector<8x128xf32> -> vector<8x128xf32>
    %36 = arith.mulf %32, %35 : vector<8x128xf32>
    %37 = math.log %30 : vector<8x128xf32>
    %38 = arith.subf %36, %37 : vector<8x128xf32>
    %cst_11 = arith.constant -3.000000e+38 : f32
    %39 = vector.broadcast %cst_11 : f32 to vector<8x128xf32>
    %40 = arith.select %4, %1, %39 : vector<8x128xi1>, vector<8x128xf32>
    %cst_12 = arith.constant dense<0xFF800000> : vector<8xf32>
    %41 = vector.multi_reduction <maximumf>, %40, %cst_12 [1] : vector<8x128xf32> to vector<8xf32>
    %42 = vector.shape_cast %41 : vector<8xf32> to vector<8x1xf32>
    %43 = vector.broadcast %42 : vector<8x1xf32> to vector<8x128xf32>
    %44 = arith.subf %1, %43 : vector<8x128xf32>
    %cst_13 = arith.constant 0.000000e+00 : f32
    %45 = vector.broadcast %cst_13 : f32 to vector<8x128xf32>
    %46 = arith.select %4, %44, %45 : vector<8x128xi1>, vector<8x128xf32>
    %47 = math.exp %46 : vector<8x128xf32>
    %48 = arith.mulf %46, %47 : vector<8x128xf32>
    %c127_i32_14 = arith.constant 127 : i32
    %49 = tpu.dynamic_rotate %47 by %c127_i32_14 dim 1 : vector<8x128xf32>, i32 -> vector<8x128xf32>
    %50 = arith.addf %47, %49 : vector<8x128xf32>
    %c127_i32_15 = arith.constant 127 : i32
    %51 = tpu.dynamic_rotate %48 by %c127_i32_15 dim 1 : vector<8x128xf32>, i32 -> vector<8x128xf32>
    %52 = arith.addf %48, %51 : vector<8x128xf32>
    %c127_i32_16 = arith.constant 127 : i32
    %53 = tpu.dynamic_rotate %1 by %c127_i32_16 dim 1 : vector<8x128xf32>, i32 -> vector<8x128xf32>
    %54 = arith.addf %1, %53 : vector<8x128xf32>
    %c126_i32_17 = arith.constant 126 : i32
    %55 = tpu.dynamic_rotate %47 by %c126_i32_17 dim 1 : vector<8x128xf32>, i32 -> vector<8x128xf32>
    %56 = arith.addf %50, %55 : vector<8x128xf32>
    %c126_i32_18 = arith.constant 126 : i32
    %57 = tpu.dynamic_rotate %48 by %c126_i32_18 dim 1 : vector<8x128xf32>, i32 -> vector<8x128xf32>
    %58 = arith.addf %52, %57 : vector<8x128xf32>
    %c126_i32_19 = arith.constant 126 : i32
    %59 = tpu.dynamic_rotate %1 by %c126_i32_19 dim 1 : vector<8x128xf32>, i32 -> vector<8x128xf32>
    %60 = arith.addf %54, %59 : vector<8x128xf32>
    %c125_i32_20 = arith.constant 125 : i32
    %61 = tpu.dynamic_rotate %47 by %c125_i32_20 dim 1 : vector<8x128xf32>, i32 -> vector<8x128xf32>
    %62 = arith.addf %56, %61 : vector<8x128xf32>
    %c125_i32_21 = arith.constant 125 : i32
    %63 = tpu.dynamic_rotate %48 by %c125_i32_21 dim 1 : vector<8x128xf32>, i32 -> vector<8x128xf32>
    %64 = arith.addf %58, %63 : vector<8x128xf32>
    %c125_i32_22 = arith.constant 125 : i32
    %65 = tpu.dynamic_rotate %1 by %c125_i32_22 dim 1 : vector<8x128xf32>, i32 -> vector<8x128xf32>
    %66 = arith.addf %60, %65 : vector<8x128xf32>
    %67 = tpu.reciprocal %62 {approx = true} : vector<8x128xf32> -> vector<8x128xf32>
    %68 = arith.mulf %64, %67 : vector<8x128xf32>
    %69 = math.log %62 : vector<8x128xf32>
    %70 = arith.subf %68, %69 : vector<8x128xf32>
    %71 = arith.subf %38, %70 : vector<8x128xf32>
    %72 = math.absf %71 : vector<8x128xf32>
    %cst_23 = arith.constant 0.000000e+00 : f32
    %73 = vector.broadcast %cst_23 : f32 to vector<8x128xf32>
    %74 = arith.select %6, %72, %73 : vector<8x128xi1>, vector<8x128xf32>
    %75 = vector.shape_cast %74 : vector<8x128xf32> to vector<1x8x128xf32>
    %cst_24 = arith.constant dense<0.000000e+00> : vector<1xf32>
    %76 = vector.multi_reduction <add>, %75, %cst_24 [1, 2] : vector<1x8x128xf32> to vector<1xf32>
    %77 = vector.shape_cast %76 : vector<1xf32> to vector<1x1x1xf32>
    %78 = vector.extract %77[0, 0, 0] : f32 from vector<1x1x1xf32>
    %c0_25 = arith.constant 0 : index
    %c0_26 = arith.constant 0 : index
    %79 = memref.load %arg3[%c0_25, %c0_26] : memref<1x1xf32, #tpu.memory_space<smem>>
    memref.store %78, %arg3[%c0_25, %c0_26] : memref<1x1xf32, #tpu.memory_space<smem>>
    %80 = arith.subf %34, %66 : vector<8x128xf32>
    %81 = arith.mulf %80, %80 : vector<8x128xf32>
    %cst_27 = arith.constant 0.000000e+00 : f32
    %82 = vector.broadcast %cst_27 : f32 to vector<8x128xf32>
    %83 = arith.select %6, %81, %82 : vector<8x128xi1>, vector<8x128xf32>
    %84 = vector.shape_cast %83 : vector<8x128xf32> to vector<1x8x128xf32>
    %cst_28 = arith.constant dense<0.000000e+00> : vector<1xf32>
    %85 = vector.multi_reduction <add>, %84, %cst_28 [1, 2] : vector<1x8x128xf32> to vector<1xf32>
    %86 = vector.shape_cast %85 : vector<1xf32> to vector<1x1x1xf32>
    %87 = vector.extract %86[0, 0, 0] : f32 from vector<1x1x1xf32>
    %c0_29 = arith.constant 0 : index
    %c0_30 = arith.constant 0 : index
    %88 = memref.load %arg4[%c0_29, %c0_30] : memref<1x1xf32, #tpu.memory_space<smem>>
    memref.store %87, %arg4[%c0_29, %c0_30] : memref<1x1xf32, #tpu.memory_space<smem>>
    return
  }
  func.func @transform_0(%arg0: i32) -> (i32, i32) {
    %c0_i32 = arith.constant 0 : i32
    %c0_i32_0 = arith.constant 0 : i32
    return %arg0, %c0_i32 : i32, i32
  }
  func.func @transform_1(%arg0: i32) -> (i32, i32) {
    %c0_i32 = arith.constant 0 : i32
    %c0_i32_0 = arith.constant 0 : i32
    return %arg0, %c0_i32 : i32, i32
  }
  func.func @transform_2(%arg0: i32) -> (i32, i32) {
    %c0_i32 = arith.constant 0 : i32
    %c0_i32_0 = arith.constant 0 : i32
    return %arg0, %c0_i32 : i32, i32
  }
  func.func @transform_3(%arg0: i32) -> (i32, i32) {
    %c0_i32 = arith.constant 0 : i32
    %c0_i32_0 = arith.constant 0 : i32
    return %arg0, %c0_i32 : i32, i32
  }
}

</mosaic_0001>

<bundles_post_ra>
// kernel: tpu_custom_call.1
= control target key start
LH: loop header
LB: loop body
LE: loop exit
PB: predicated region body
PF: predicated region fallthrough
CT: control target
= control target key end

     0   :  { %9 = vsyncpa [#allocation3], 0  ;;  %s384_s0 = inlined_call_operand.hbm [shape: f32[8,128], index: 0, kind: input, shape index: {}]   ;;  %s385_s1 = inlined_call_operand.hbm [shape: f32[8,128], index: 1, kind: input, shape index: {}]   ;;  %s386_s2 = inlined_call_operand.hbm [shape: f32[1,1], index: 2, kind: output, shape index: {0}]   ;;  %s387_s3 = inlined_call_operand.hbm [shape: f32[1,1], index: 3, kind: output, shape index: {1}]  }
   0x1   :  { %10 = vsyncpa [#allocation6], 0 }
   0x2   :  { %11 = vsyncpa [#allocation4], 0 }
   0x3   :  { %12 = vsyncpa [#allocation9], 0  ;;  %s275_s12 = smov [#allocation2]   ;;  %s276_s14 = smov [#allocation5]  }
   0x4   :  { %s19_s13 = sshll.u32 %s275_s12, 4  ;;  %s29_s15 = sshll.u32 %s276_s14, 4  ;;  %s20_s13 = int_to_ptr.vmem [resolvable:$true] %s19_s13  ;;  %s30_s15 = int_to_ptr.vmem [resolvable:$true] %s29_s15 }
   0x5   :  { %s203_s18 = scalar_lea.hbm %s384_s0, 128 }
   0x6   :  { %p204_p0 = scmp.ne.s32.totalorder %s384_s0, %s203_s18  ;;  %p207_p1 = scmp.lt.u32.totalorder %s203_s18, %s384_s0 }
   0x8   :  { %p209_p2 = pnand %p207_p1, %p204_p0 }
   0xa   :  { %212 = shalt.err (!%p209_p2)
}
   0xb   :  { %s213_s23 = scalar_lea.vmem %s20_s13, 128  ;;  %p218_p4 = scmp.lt.s32.totalorder %s20_s13, %s20_s13 }
   0xc   :  { %p214_p3 = scmp.ne.s32.totalorder %s20_s13, %s213_s23  ;;  %p219_p5 = scmp.lt.s32.totalorder %s213_s23, %s213_s23 }
   0xe   :  { %p220_p6 = por %p219_p5, %p218_p4 }
  0x10   :  { %p221_p7 = pnand %p220_p6, %p214_p3 }
  0x12   :  { %224 = shalt.err (!%p221_p7)
}
  0x13   :  { %22 = dma.hbm_to_vmem [thread:$0]  %s384_s0, 128, %s20_s13, [#allocation3]  }
  0x14   :  { %s225_s28 = scalar_lea.hbm %s385_s1, 128 }
  0x15   :  { %p226_p8 = scmp.ne.s32.totalorder %s385_s1, %s225_s28  ;;  %p229_p9 = scmp.lt.u32.totalorder %s225_s28, %s385_s1 }
  0x17   :  { %p231_p10 = pnand %p229_p9, %p226_p8 }
  0x19   :  { %234 = shalt.err (!%p231_p10)
}
  0x1a   :  { %s235_s6 = scalar_lea.vmem %s30_s15, 128  ;;  %p240_p12 = scmp.lt.s32.totalorder %s30_s15, %s30_s15 }
  0x1b   :  { %p236_p11 = scmp.ne.s32.totalorder %s30_s15, %s235_s6  ;;  %p241_p13 = scmp.lt.s32.totalorder %s235_s6, %s235_s6 }
  0x1d   :  { %p242_p0 = por %p241_p13, %p240_p12 }
  0x1f   :  { %p243_p1 = pnand %p242_p0, %p236_p11 }
  0x21   :  { %246 = shalt.err (!%p243_p1)
}
  0x22   :  { %32 = dma.hbm_to_vmem [thread:$0]  %s385_s1, 128, %s30_s15, [#allocation6]  }
  0x23   :  { %267 = dma.done.wait [#allocation3], 128  }
  0x24   :  { %268 = vsyncadd [#allocation3], 4294967168 }
  0x25   :  { %269 = dma.done.wait [#allocation6], 128  }
  0x26   :  { %270 = vsyncadd [#allocation6], 4294967168  ;;  %v41_v0 = vlaneseq  ;;  %v329_v2 = vld [vmem:[#allocation2] sm:$0xff]  ;;  %v331_v3 = vld [vmem:[#allocation5] sm:$0xff]  ;;  %s277_s1 = smov 127   ;;  %s278_s8 = smov 126  }
  0x27   :  { %59 = vrot.lane.b32.xlu1 %v329_v2, %s277_s1  ;;  %s279_s9 = smov 125   ;;  %s247_s14 = scalar_lea.hbm %s386_s2, 16 }
  0x28   :  { %v326_v1 = vand.u32 127, %v41_v0  ;;  %p248_p2 = scmp.ne.s32.totalorder %s386_s2, %s247_s14  ;;  %p251_p3 = scmp.lt.u32.totalorder %s247_s14, %s386_s2 }
  0x2a   :  { %vm43_vm0 = vcmp.lt.s32.totalorder %v326_v1, 16  ;;  %vm44_vm1 = vcmp.lt.s32.totalorder %v326_v1, 13  ;;  %p253_p4 = pnand %p251_p3, %p248_p2 }
  0x2b   :  { %v45_v4 = vsel %vm43_vm0, %v329_v2, -3e+38  ;;  %v85_v5 = vsel %vm43_vm0, %v331_v3, -3e+38  ;;  %99 = vrot.lane.b32.xlu1 %v331_v3, %s277_s1 }
  0x2c   :  { %46 = vmax.xlane.f32.xlu0 %v45_v4 }
  0x30   :  { %86 = vmax.xlane.f32.xlu0 %v85_v5 }
  0x99   :  { %v60_v18 = vpop.permute.xlu1 %59 }
  0x9a   :  { %v61_v52 = vadd.f32 %v60_v18, %v329_v2 }
  0x9d   :  { %v100_v19 = vpop.permute.xlu1 %99 }
  0x9e   :  { %v101_v53 = vadd.f32 %v100_v19, %v331_v3 }
  0xb9   :  { %v47_v6 = vpop.xlane.xlu0 %46 }
  0xba   :  { %v48_v7 = vsub.f32 %v329_v2, %v47_v6 }
  0xbc   :  { %v49_v8 = vsel %vm43_vm0, %v48_v7, 0.0 }
  0xbd   :  { %v50_v9 = vmul.f32 1.442695, %v49_v8  ;;  %v87_v10 = vpop.xlane.xlu0 %86 }
  0xbe   :  { %v88_v11 = vsub.f32 %v331_v3, %v87_v10 }
  0xbf   :  { %191 = vpow2.f32 %v50_v9 }
  0xc0   :  { %v89_v12 = vsel %vm43_vm0, %v88_v11, 0.0 }
  0xc1   :  { %v90_v13 = vmul.f32 1.442695, %v89_v12 }
  0xc3   :  { %193 = vpow2.f32 %v90_v13 }
  0xc9   :  { %v192_v14 = vpop.eup %191 }
  0xca   :  { %62 = vrot.lane.b32.xlu0 %v192_v14, %s278_s8  ;;  %53 = vrot.lane.b32.xlu1 %v192_v14, %s277_s1  ;;  %v52_v17 = vmul.f32 %v192_v14, %v49_v8 }
  0xcd   :  { %v194_v15 = vpop.eup %193 }
  0xce   :  { %108 = vrot.lane.b32.xlu0 %v331_v3, %s278_s8  ;;  %93 = vrot.lane.b32.xlu1 %v194_v15, %s277_s1  ;;  %v92_v16 = vmul.f32 %v194_v15, %v89_v12 }
  0xd2   :  { %102 = vrot.lane.b32.xlu1 %v194_v15, %s278_s8  ;;  %105 = vrot.lane.b32.xlu0 %v92_v16, %s278_s8 }
  0xd6   :  { %71 = vrot.lane.b32.xlu1 %v192_v14, %s279_s9  ;;  %74 = vrot.lane.b32.xlu0 %v52_v17, %s279_s9 }
  0xda   :  { %111 = vrot.lane.b32.xlu1 %v194_v15, %s279_s9  ;;  %114 = vrot.lane.b32.xlu0 %v92_v16, %s279_s9 }
  0xde   :  { %56 = vrot.lane.b32.xlu1 %v52_v17, %s277_s1  ;;  %117 = vrot.lane.b32.xlu0 %v331_v3, %s279_s9 }
  0xe2   :  { %96 = vrot.lane.b32.xlu1 %v92_v16, %s277_s1 }
  0xe6   :  { %65 = vrot.lane.b32.xlu1 %v52_v17, %s278_s8 }
  0xea   :  { %68 = vrot.lane.b32.xlu1 %v329_v2, %s278_s8 }
  0xee   :  { %77 = vrot.lane.b32.xlu1 %v329_v2, %s279_s9 }
 0x13c   :  { %v54_v20 = vpop.permute.xlu1 %53  ;;  %v63_v21 = vpop.permute.xlu0 %62 }
 0x13d   :  { %v55_v23 = vadd.f32 %v192_v14, %v54_v20 }
 0x13f   :  { %v64_v26 = vadd.f32 %v63_v21, %v55_v23 }
 0x140   :  { %v94_v22 = vpop.permute.xlu1 %93  ;;  %v109_v25 = vpop.permute.xlu0 %108 }
 0x141   :  { %v95_v28 = vadd.f32 %v194_v15, %v94_v22  ;;  %v110_v57 = vadd.f32 %v109_v25, %v101_v53 }
 0x144   :  { %v103_v24 = vpop.permute.xlu1 %102  ;;  %v106_v31 = vpop.permute.xlu0 %105 }
 0x145   :  { %v104_v30 = vadd.f32 %v103_v24, %v95_v28 }
 0x148   :  { %v72_v27 = vpop.permute.xlu1 %71  ;;  %v75_v35 = vpop.permute.xlu0 %74 }
 0x149   :  { %v73_v29 = vadd.f32 %v72_v27, %v64_v26 }
 0x14b   :  { %195 = vlog2.f32 %v73_v29 }
 0x14c   :  { %v112_v32 = vpop.permute.xlu1 %111  ;;  %v115_v41 = vpop.permute.xlu0 %114 }
 0x14d   :  { %v113_v33 = vadd.f32 %v112_v32, %v104_v30 }
 0x14f   :  { %197 = vrcp.f32 %v113_v33 }
 0x150   :  { %199 = vlog2.f32 %v113_v33  ;;  %v57_v34 = vpop.permute.xlu1 %56  ;;  %v118_v56 = vpop.permute.xlu0 %117 }
 0x151   :  { %201 = vrcp.f32 %v73_v29  ;;  %v58_v38 = vadd.f32 %v57_v34, %v52_v17  ;;  %v119_v62 = vadd.f32 %v118_v56, %v110_v57 }
 0x154   :  { %v97_v36 = vpop.permute.xlu1 %96 }
 0x155   :  { %v98_v37 = vadd.f32 %v97_v36, %v92_v16  ;;  %v196_v40 = vpop.eup %195 }
 0x156   :  { %v83_v54 = vmul.f32 0.6931472, %v196_v40 }
 0x157   :  { %v107_v39 = vadd.f32 %v106_v31, %v98_v37 }
 0x158   :  { %v66_v42 = vpop.permute.xlu1 %65 }
 0x159   :  { %v198_v43 = vpop.eup %197  ;;  %v116_v44 = vadd.f32 %v115_v41, %v107_v39  ;;  %v67_v45 = vadd.f32 %v66_v42, %v58_v38 }
 0x15a   :  { %v200_v46 = vpop.eup %199 }
 0x15b   :  { %v123_v47 = vmul.f32 0.6931472, %v200_v46  ;;  %v121_v48 = vmul.f32 %v198_v43, %v116_v44  ;;  %v76_v49 = vadd.f32 %v75_v35, %v67_v45  ;;  %v202_v50 = vpop.eup %201 }
 0x15c   :  { %v69_v51 = vpop.permute.xlu1 %68 }
 0x15d   :  { %v81_v55 = vmul.f32 %v202_v50, %v76_v49  ;;  %v70_v58 = vadd.f32 %v69_v51, %v61_v52  ;;  %v124_v60 = vsub.f32 %v121_v48, %v123_v47 }
 0x15f   :  { %v84_v59 = vsub.f32 %v81_v55, %v83_v54 }
 0x160   :  { %v78_v61 = vpop.permute.xlu1 %77 }
 0x161   :  { %v79_v63 = vadd.f32 %v78_v61, %v70_v58  ;;  %v125_v0 = vsub.f32 %v84_v59, %v124_v60 }
 0x163   :  { %v139_v4 = vsub.f32 %v79_v63, %v119_v62  ;;  %v126_v5 = vand.u32 2147483647, %v125_v0 }
 0x165   :  { %v127_v6 = vsel %vm44_vm1, %v126_v5, 0.0  ;;  %v140_v7 = vmul.f32 %v139_v4, %v139_v4 }
 0x166   :  { %128 = vadd.xlane.f32.xlu1 %v127_v6 }
 0x167   :  { %v141_v2 = vsel %vm44_vm1, %v140_v7, 0.0 }
 0x168   :  { %142 = vadd.xlane.f32.xlu0 %v141_v2 }
 0x1f3   :  { %v129_v3 = vpop.xlane.xlu1 %128 }
 0x1f4   :  { %v130_v8 = vrot.slane %v129_v3, 4 }
 0x1f5   :  { %v143_v9 = vpop.xlane.xlu0 %142 }
 0x1f6   :  { %v131_v10 = vadd.f32 %v130_v8, %v129_v3  ;;  %v144_v11 = vrot.slane %v143_v9, 4 }
 0x1f8   :  { %v132_v12 = vrot.slane %v131_v10, 2  ;;  %v145_v13 = vadd.f32 %v144_v11, %v143_v9 }
 0x1fa   :  { %v146_v14 = vrot.slane %v145_v13, 2  ;;  %v133_v15 = vadd.f32 %v132_v12, %v131_v10 }
 0x1fc   :  { %v147_v16 = vadd.f32 %v146_v14, %v145_v13  ;;  %v134_v17 = vrot.slane %v133_v15, 1 }
 0x1fe   :  { %v135_v18 = vadd.f32 %v134_v17, %v133_v15  ;;  %v148_v1 = vrot.slane %v147_v16, 1 }
 0x200   :  { %180 = vpush %v135_v18  ;;  %v149_v19 = vadd.f32 %v148_v1, %v147_v16 }
 0x202   :  { %182 = vpush %v149_v19 }
 0x231   :  { %s181_s10 = spop %180 }
 0x232   :  { %138 = sst [smem:[#allocation7]] %s181_s10 }
 0x233   :  { %s183_s11 = spop %182 }
 0x234   :  { %152 = sst [smem:[#allocation8]] %s183_s11 }
 0x235   :  { %256 = shalt.err (!%p253_p4)
}
 0x236   :  { %s280_s19 = smov [#allocation7]   ;;  %s257_s24 = scalar_lea.hbm %s387_s3, 16 }
 0x237   :  { %160 = dma.smem_to_hbm %s280_s19, 16, %s386_s2, [#allocation4]  }
 0x238   :  { %p258_p5 = scmp.ne.s32.totalorder %s387_s3, %s257_s24  ;;  %p261_p6 = scmp.lt.u32.totalorder %s257_s24, %s387_s3 }
 0x23a   :  { %p263_p7 = pnand %p261_p6, %p258_p5 }
 0x23c   :  { %266 = shalt.err (!%p263_p7)
}
 0x23d   :  { %s281_s29 = smov [#allocation8]  }
 0x23e   :  { %168 = dma.smem_to_hbm %s281_s29, 16, %s387_s3, [#allocation9]  }
 0x23f   :  { %271 = dma.done.wait [#allocation4], 16  }
 0x240   :  { %272 = vsyncadd [#allocation4], 4294967280 }
 0x241   :  { %273 = dma.done.wait [#allocation9], 16  }
 0x242   :  { %274 = vsyncadd [#allocation9], 4294967280 }
 0x243   :  { %175 = sfence }
 0x244   :  { %176 = vsyncpa [#allocation3], 1 }
 0x245   :  { %177 = vsyncpa [#allocation6], 1 }
 0x246   :  { %178 = vsyncpa [#allocation4], 1 }
 0x247   :  { %179 = vsyncpa [#allocation9], 1 }

</bundles_post_ra>
